<compile_context>
chip_gen: v7x
topology: tpu7x:2x2x1
jax: 0.10.0
libtpu: 0.0.40
codegen_flags: <defaults>
</compile_context>

<pallas_src>
import functools
import math

import numpy as np
import jax
import jax.numpy as jnp
from jax.experimental import pallas as pl
from jax.experimental.pallas import tpu as pltpu


# ----------------------------------------------------------------------------
# Interpolation weight matrices (match F.interpolate semantics).
# ----------------------------------------------------------------------------
def _interp_matrix_np(out_size, in_size, mode):
    """(out_size, in_size) row matrix replicating F.interpolate weights."""
    out_idx = np.arange(out_size, dtype=np.float64)
    scale = in_size / out_size
    W = np.zeros((out_size, in_size), dtype=np.float32)
    if mode == "nearest":
        src = np.minimum(np.floor(out_idx * scale).astype(np.int64), in_size - 1)
        W[np.arange(out_size), src] = 1.0
    elif mode == "nearest-exact":
        src = np.minimum(np.floor((out_idx + 0.5) * scale).astype(np.int64), in_size - 1)
        W[np.arange(out_size), src] = 1.0
    elif mode in ("linear", "bilinear"):
        # PyTorch default align_corners=False (half-pixel centers, clamp at 0).
        src = np.maximum((out_idx + 0.5) * scale - 0.5, 0.0)
        i0 = np.minimum(np.floor(src).astype(np.int64), in_size - 1)
        i1 = i0 + (i0 < in_size - 1).astype(np.int64)
        w1 = (src - i0).astype(np.float32)
        w0 = 1.0 - w1
        np.add.at(W, (np.arange(out_size), i0), w0)
        np.add.at(W, (np.arange(out_size), i1), w1)
    else:
        # TODO(synk): bicubic / trilinear / area weight matrices not implemented.
        raise NotImplementedError(f"resize mode {mode!r} not supported in Pallas port")
    return W


# ----------------------------------------------------------------------------
# Hardware / tiling helpers.
# ----------------------------------------------------------------------------
def _round_up(x, m):
    return ((x + m - 1) // m) * m


def _sublane_rows(dtype):
    """Sublane granule for the second-minor block dim (8 f32, 16 bf16, 32 int8)."""
    return {4: 8, 2: 16, 1: 32}.get(jnp.dtype(dtype).itemsize, 8)


def _vmem_limit_bytes():
    """Scoped-VMEM budget: generous on 128 MiB chips, conservative on v7x (64 MiB)."""
    cap = 64 * 1024 * 1024
    try:
        info_cap = getattr(pltpu.get_tpu_info(), "vmem_capacity_bytes", None)
        if info_cap:
            cap = int(info_cap)
    except Exception:
        pass
    return (96 << 20) if cap >= (128 << 20) else (32 << 20)


def _chip_params():
    """Approx (HBM bytes/s, f32 MXU flop/s, bf16 MXU flop/s) per TensorCore."""
    kind = ""
    try:
        kind = jax.devices()[0].device_kind.lower()
    except Exception:
        pass
    if "v5e" in kind or "v5 lite" in kind or "v5litepod" in kind:
        return 8.2e11, 4.9e13, 1.97e14
    if "v6" in kind:
        return 1.35e12, 2.3e14, 9.18e14
    if "v7" in kind:
        return 1.6e12, 2.5e14, 9.96e14
    if "v4" in kind:
        return 1.2e12, 6.9e13, 2.75e14
    return 8.2e11, 6.0e13, 2.4e14  # unknown: conservative (favours separable path)


def _prefer_kron(h_in, w_in, h_out, w_out, in_dtype, w_dtype):
    """Roofline switch: use the dense kron matmul only while it stays HBM-bound."""
    k, m = h_in * w_in, h_out * w_out
    hbm_bw, f32_flops, bf16_flops = _chip_params()
    in_b = jnp.dtype(in_dtype).itemsize
    w_b = jnp.dtype(w_dtype).itemsize
    flops = bf16_flops if (in_b < 4 and w_b < 4) else f32_flops
    hbm_t = (k + m) * in_b / hbm_bw          # streamed bytes per image
    mxu_t = 2.0 * k * m / flops              # dense kron MACs per image
    # Kronecker weight (double-buffered by the pipeline) must stay well in VMEM.
    w_vmem = 2 * k * _round_up(m, 128) * w_b
    fits = w_vmem <= _vmem_limit_bytes() // 2
    # While memory-bound the extra kron FLOPs are free MXU filler; past ~1.25x
    # the HBM time the MXU becomes the critical unit and the separable form wins.
    return fits and (mxu_t <= 1.25 * hbm_t)


def _pick_tile_n(n, per_row_bytes, budget_bytes, sublane):
    """Rows per grid step:
       * multiple of the dtype sublane granule (or == n for tiny inputs),
       * fits the (double-buffer-accounted) VMEM budget,
       * streams ~2 MiB per step (HBM-roofline sweet spot),
       * >=2 grid steps when possible (v7x megacore / DMA overlap), up to ~8
         steps while each step still moves >=1 MiB.
    """
    n = max(int(n), 1)
    n_gran = -(-n // sublane)
    gran_bytes = max(int(per_row_bytes) * sublane, 1)

    tn_gran = min(n_gran,
                  max(1, budget_bytes // gran_bytes),
                  max(1, (2 << 20) // gran_bytes))

    want_steps = 2 if n_gran >= 2 else 1
    want_steps = max(want_steps,
                     min(8, n_gran, (n_gran * gran_bytes) // (1 << 20)))
    tn_gran = max(1, min(tn_gran, n_gran // want_steps))
    return min(tn_gran * sublane, n)


# ----------------------------------------------------------------------------
# Kernels.
# ----------------------------------------------------------------------------
def _resize_kron_kernel(w_ref, x_ref, o_ref):
    # x_ref: (tn, K)   w_ref: (K, M)   o_ref: (tn, M) -- one lane-dense MXU matmul.
    x = x_ref[...]
    w = w_ref[...]
    if x.dtype != w.dtype:
        x = x.astype(w.dtype)
    o_ref[...] = jnp.dot(x, w, preferred_element_type=jnp.float32).astype(o_ref.dtype)


def _resize_separable_kernel(wh_ref, ww_ref, x_ref, o_ref, *, h_first, flat_out):
    n = x_ref.shape[0]
    h_out, h_in = wh_ref.shape
    w_out, w_in = ww_ref.shape
    x = x_ref[...].astype(jnp.float32)
    # Broadcast the resident weights over the batch so both contractions are
    # standard batched matmuls (the dot_general form Mosaic lowers directly).
    wh_b = jnp.broadcast_to(wh_ref[...].astype(jnp.float32), (n, h_out, h_in))
    ww_b = jnp.broadcast_to(ww_ref[...].astype(jnp.float32), (n, w_out, w_in))

    def resize_h(t):  # (n, H_in, W) -> (n, H_out, W)
        return jnp.einsum("nhp,npw->nhw", wh_b, t,
                          preferred_element_type=jnp.float32)

    def resize_w(t):  # (n, H, W_in) -> (n, H, W_out)
        return jnp.einsum("nhq,nwq->nhw", t, ww_b,
                          preferred_element_type=jnp.float32)

    out = resize_w(resize_h(x)) if h_first else resize_h(resize_w(x))
    if flat_out:
        out = out.reshape(n, h_out * w_out)   # lane-dense store slab (W_out < 128)
    o_ref[...] = out.astype(o_ref.dtype)


# ----------------------------------------------------------------------------
# pallas_call wrappers.
# ----------------------------------------------------------------------------
def pallas_kron_resize(x2, w_kt):
    """x2: (N, H_in*W_in) -> (N, H_out*W_out) via out = x2 @ w_kt (one matmul/tile)."""
    n, k = x2.shape
    m = w_kt.shape[1]
    in_b = jnp.dtype(x2.dtype).itemsize
    w_b = jnp.dtype(w_kt.dtype).itemsize
    sub = _sublane_rows(x2.dtype)
    k_pad, m_pad = _round_up(k, 128), _round_up(m, 128)

    vmem_limit = _vmem_limit_bytes()
    # Resident weight: constant index_map => DMA'd once, but the pipeline still
    # allocates two buffers for it, so account for both.
    # TODO(synk): single-buffer it (pl.Buffered(1)) once universally supported;
    # with the ~2 MiB/step tile target it is not the binding constraint.
    w_vmem = 2 * k * m_pad * w_b
    budget = max(vmem_limit - w_vmem - (4 << 20), 1 << 20)
    per_row = (2 * (k_pad * in_b + m_pad * in_b)                    # in/out blocks (x2 bufs)
               + m_pad * 4                                          # f32 matmul result row
               + (k_pad * 4 if (in_b < 4 and w_b == 4) else 0))     # in-kernel upcast of x
    tn = _pick_tile_n(n, per_row, budget, sub)

    return pl.pallas_call(
        _resize_kron_kernel,
        out_shape=jax.ShapeDtypeStruct((n, m), x2.dtype),
        grid_spec=pltpu.PrefetchScalarGridSpec(
            num_scalar_prefetch=0,
            grid=(pl.cdiv(n, tn),),            # ragged last tile: masked by Pallas
            in_specs=[
                pl.BlockSpec((k, m), lambda i: (0, 0)),    # resident weight
                pl.BlockSpec((tn, k), lambda i: (i, 0)),   # streaming input rows
            ],
            out_specs=pl.BlockSpec((tn, m), lambda i: (i, 0)),
        ),
        compiler_params=pltpu.CompilerParams(
            dimension_semantics=("parallel",),
            vmem_limit_bytes=vmem_limit,
        ),
    )(w_kt, x2)


def pallas_separable_resize(x3, wh, ww):
    """(N, H_in, W_in) -> (N, H_out, W_out) via two batched MXU matmuls."""
    n, h_in, w_in = x3.shape
    h_out, w_out = wh.shape[0], ww.shape[0]
    in_b = jnp.dtype(x3.dtype).itemsize
    sub = _sublane_rows(x3.dtype)

    # Contract the axis that reduces the work more first (FLOPs + intermediate).
    h_first = h_out * w_in * (h_in + w_out) <= h_in * w_out * (w_in + h_out)
    # Lane-dense store: flatten (H_out, W_out) into lanes when W_out would
    # otherwise leave most of the 128 lanes masked on every vst.
    flat_out = (w_out % 128) != 0

    h_in_p, w_in_p = _round_up(h_in, 128), _round_up(w_in, 128)
    w_out_p = _round_up(w_out, 128)
    hw_out_p = _round_up(h_out * w_out, 128)

    vmem_limit = _vmem_limit_bytes()
    w_vmem = 2 * 4 * (h_out * h_in_p + w_out * w_in_p)              # weights (x2 bufs)
    budget = max(vmem_limit - w_vmem - (4 << 20), 1 << 20)
    out_row = hw_out_p if flat_out else h_out * w_out_p
    per_row = (2 * h_in * w_in_p * in_b                             # in block (x2 bufs)
               + 2 * out_row * in_b                                 # out block (x2 bufs)
               + (h_in * w_in_p * 4 if in_b < 4 else 0)             # f32 upcast of x
               + (h_out * h_in_p + w_out * w_in_p) * 4              # broadcast weights
               + (h_out * w_in_p if h_first else h_in * w_out_p) * 4  # f32 intermediate
               + h_out * w_out_p * 4                                # f32 result
               + (hw_out_p * 4 if flat_out else 0))                 # flattened copy
    tn = _pick_tile_n(n, per_row, budget, sub)
    # TODO(synk): images whose per-row footprint exceeds VMEM would need extra
    # spatial tiling; not required for decoder-sized inputs.

    out_shape = (n, h_out * w_out) if flat_out else (n, h_out, w_out)
    out_spec = (pl.BlockSpec((tn, h_out * w_out), lambda i: (i, 0)) if flat_out
                else pl.BlockSpec((tn, h_out, w_out), lambda i: (i, 0, 0)))

    kernel = functools.partial(_resize_separable_kernel,
                               h_first=h_first, flat_out=flat_out)
    out = pl.pallas_call(
        kernel,
        out_shape=jax.ShapeDtypeStruct(out_shape, x3.dtype),
        grid_spec=pltpu.PrefetchScalarGridSpec(
            num_scalar_prefetch=0,
            grid=(pl.cdiv(n, tn),),
            in_specs=[
                pl.BlockSpec((h_out, h_in), lambda i: (0, 0)),       # resident Wh
                pl.BlockSpec((w_out, w_in), lambda i: (0, 0)),       # resident Ww
                pl.BlockSpec((tn, h_in, w_in), lambda i: (i, 0, 0)),  # streaming images
            ],
            out_specs=out_spec,
        ),
        compiler_params=pltpu.CompilerParams(
            dimension_semantics=("parallel",),
            vmem_limit_bytes=vmem_limit,
        ),
    )(wh, ww, x3)
    return out.reshape(n, h_out, w_out) if flat_out else out


# ----------------------------------------------------------------------------
# Module wrapper (forward-pass semantics of the PyTorch `Resize`).
# ----------------------------------------------------------------------------
class Resize:
    """JAX/Pallas port of the PyTorch `Resize` module (forward pass only)."""

    MODES = {'nearest', 'linear', 'bilinear', 'bicubic', 'trilinear', 'area', 'nearest-exact'}

    def __init__(self, size=None, resize_mode='bilinear', patch_mode=False, channels_last=False):
        if resize_mode not in Resize.MODES:
            raise ValueError(f'`mode` must be one of {Resize.MODES}')
        self.size = size
        self.resize_mode = resize_mode
        self.patch_mode = patch_mode
        self.channels_last = channels_last
        self.expected_dims = 3 if patch_mode else 4

    def __call__(self, x, size_tensor=None):
        dims_to_flatten = x.ndim - self.expected_dims
        flattened_dims = None
        if dims_to_flatten > 0:
            flattened_dims = x.shape[:dims_to_flatten + 1]
            x = x.reshape((-1,) + x.shape[dims_to_flatten + 1:])
        elif dims_to_flatten < 0:
            raise ValueError(
                f'Tensor needs at least {self.expected_dims} dimensions, but only has {x.ndim}')

        if self.patch_mode:
            if self.channels_last:
                x = jnp.swapaxes(x, -2, -1)
            n_channels, n_patches = x.shape[-2:]
            patch_size = int(math.sqrt(n_patches))
            if patch_size * patch_size != n_patches:
                raise ValueError(
                    f'The number of patches needs to be a perfect square, but is {n_patches}.')
            x = x.reshape(-1, n_channels, patch_size, patch_size)
        elif self.channels_last:
            x = jnp.transpose(x, (0, 3, 1, 2))

        if self.size is None:
            if size_tensor is None:
                raise ValueError('`size` is `None` but no `size_tensor` was passed.')
            if size_tensor.ndim <= 2 and size_tensor.shape[-1] == 2:
                # TODO(synk): data-dependent target size needs concrete (non-traced)
                # values; traced size_tensor values are not supported under jit.
                hw = np.asarray(size_tensor).reshape(-1, 2)[0]
                size = (int(hw[0]), int(hw[1]))
            else:
                size = tuple(size_tensor.shape[-2:])
        else:
            size = self.size
        if isinstance(size, int):
            size = (size, size)

        b, c, h_in, w_in = x.shape
        h_out, w_out = size

        wh_np = _interp_matrix_np(h_out, h_in, self.resize_mode)   # (H_out, H_in)
        ww_np = _interp_matrix_np(w_out, w_in, self.resize_mode)   # (W_out, W_in)

        nearest = self.resize_mode in ('nearest', 'nearest-exact')
        low_prec = (jnp.issubdtype(x.dtype, jnp.floating)
                    and jnp.dtype(x.dtype).itemsize < 4)
        # Interpolating weights stay f32 (rows sum to exactly 1); one-hot nearest
        # weights are exact in the input's low precision (halves weight DMA bytes).
        w_dtype = x.dtype if (nearest and low_prec) else jnp.float32
        # TODO(synk): nearest could be a pure gather (no MXU work); kept as a
        # one-hot matmul since it stays HBM-bound at the sizes routed to kron.

        if _prefer_kron(h_in, w_in, h_out, w_out, x.dtype, w_dtype):
            # Lane-dense single-matmul path: out2 = x2 @ kron(Wh, Ww).T
            w_kt = jnp.asarray(np.kron(wh_np, ww_np).T, dtype=w_dtype)   # (K, M)
            out2 = pallas_kron_resize(x.reshape(b * c, h_in * w_in), w_kt)
            out = out2.reshape(b, c, h_out, w_out)
        else:
            wh = jnp.asarray(wh_np, dtype=jnp.float32)
            ww = jnp.asarray(ww_np, dtype=jnp.float32)
            out = pallas_separable_resize(x.reshape(b * c, h_in, w_in), wh, ww)
            out = out.reshape(b, c, h_out, w_out)

        if dims_to_flatten > 0:
            out = out.reshape(tuple(flattened_dims) + out.shape[1:])
        return out


# ----------------------------------------------------------------------------
# Self-test.
# ----------------------------------------------------------------------------
if __name__ == "__main__":
    key = jax.random.PRNGKey(0)
    x = jax.random.normal(key, (2, 4, 16, 16), dtype=jnp.float32)   # (B, C, H, W), NCHW

    def ref_resize(xf, h_out, w_out, mode):
        wh = jnp.asarray(_interp_matrix_np(h_out, xf.shape[-2], mode))
        ww = jnp.asarray(_interp_matrix_np(w_out, xf.shape[-1], mode))
        y = jnp.einsum("hp,bcpq->bchq", wh, xf.astype(jnp.float32))
        return jnp.einsum("bchq,wq->bchw", y, ww)

    # 1) Bilinear upsample 16x16 -> 24x24 (kron path on most generations).
    r1 = Resize(size=(24, 24), resize_mode='bilinear')
    y1 = jax.block_until_ready(r1(x))
    assert y1.shape == (2, 4, 24, 24), y1.shape
    np.testing.assert_allclose(np.asarray(y1), np.asarray(ref_resize(x, 24, 24, 'bilinear')),
                               rtol=1e-4, atol=1e-4)

    # 2) Nearest downsample 16x16 -> 8x8 (one-hot weights) against gather reference.
    r2 = Resize(size=(8, 8), resize_mode='nearest')
    y2 = jax.block_until_ready(r2(x))
    assert y2.shape == (2, 4, 8, 8), y2.shape
    idx = (np.arange(8) * 2).astype(np.int64)
    np.testing.assert_allclose(np.asarray(y2), np.asarray(x)[:, :, idx][:, :, :, idx],
                               rtol=1e-6, atol=1e-6)

    # 3) Larger spatial 64x64 -> 48x48: separable path on all generations,
    #    W_out < 128 exercises the lane-dense flattened store.
    x3 = jax.random.normal(jax.random.PRNGKey(0), (2, 3, 64, 64), dtype=jnp.float32)
    r3 = Resize(size=(48, 48), resize_mode='bilinear')
    y3 = jax.block_until_ready(r3(x3))
    assert y3.shape == (2, 3, 48, 48), y3.shape
    np.testing.assert_allclose(np.asarray(y3), np.asarray(ref_resize(x3, 48, 48, 'bilinear')),
                               rtol=1e-4, atol=1e-4)

    # 4) bf16 input (sublane-16 tiling), f32 weights, loose tolerance (bf16 quantization).
    yb = jax.block_until_ready(r1(x.astype(jnp.bfloat16)))
    assert yb.dtype == jnp.bfloat16 and yb.shape == (2, 4, 24, 24)
    np.testing.assert_allclose(np.asarray(yb).astype(np.float32),
                               np.asarray(ref_resize(x, 24, 24, 'bilinear')),
                               rtol=5e-2, atol=5e-2)

    print("KERNEL_OK")
</pallas_src>

<mosaic_0001>
module attributes {stable_mosaic.version = 11 : i64} {
  func.func @_resize_kron_kernel(%arg0: i32, %arg1: memref<256x576xf32, #tpu.memory_space<vmem>>, %arg2: memref<8x256xf32, #tpu.memory_space<vmem>>, %arg3: memref<8x576xf32, #tpu.memory_space<vmem>>) attributes {dimension_semantics = [#tpu.dimension_semantics<parallel>], iteration_bounds = array<i64: 1>, scalar_prefetch = 0 : i64, scratch_operands = 0 : i64, tpu.core_type = #tpu.core_type<tc>, window_params = [{pipeline_mode = #tpu.pipeline_mode<synchronous>, transform_indices = @transform_0, window_bounds = array<i64: 256, 576>}, {transform_indices = @transform_1, window_bounds = array<i64: 8, 256>}, {transform_indices = @transform_2, window_bounds = array<i64: 8, 576>}]} {
    %c0 = arith.constant 0 : index
    %c0_0 = arith.constant 0 : index
    %0 = vector.load %arg2[%c0, %c0_0] : memref<8x256xf32, #tpu.memory_space<vmem>>, vector<8x256xf32>
    %c0_1 = arith.constant 0 : index
    %c0_2 = arith.constant 0 : index
    %1 = vector.load %arg1[%c0_1, %c0_2] : memref<256x576xf32, #tpu.memory_space<vmem>>, vector<256x576xf32>
    %cst = arith.constant dense<0.000000e+00> : vector<8x576xf32>
    %2 = tpu.matmul %0, %1, %cst {dimension_numbers = #tpu.dot_dimension_numbers<[1], [0], [0], [1], [0, 0, 1, 1], [], []>} : vector<8x256xf32>, vector<256x576xf32>, vector<8x576xf32> -> vector<8x576xf32>
    %c0_3 = arith.constant 0 : index
    %c0_4 = arith.constant 0 : index
    %3 = vector.load %arg3[%c0_3, %c0_4] : memref<8x576xf32, #tpu.memory_space<vmem>>, vector<8x576xf32>
    tpu.vector_store %arg3[%c0_3, %c0_4], %2 {strides = array<i32>} : memref<8x576xf32, #tpu.memory_space<vmem>>, vector<8x576xf32>,
    return
  }
  func.func @transform_0(%arg0: i32) -> (i32, i32) {
    %c0_i32 = arith.constant 0 : i32
    %c0_i32_0 = arith.constant 0 : i32
    %c0_i32_1 = arith.constant 0 : i32
    return %c0_i32, %c0_i32_0 : i32, i32
  }
  func.func @transform_1(%arg0: i32) -> (i32, i32) {
    %c0_i32 = arith.constant 0 : i32
    %c0_i32_0 = arith.constant 0 : i32
    return %arg0, %c0_i32 : i32, i32
  }
  func.func @transform_2(%arg0: i32) -> (i32, i32) {
    %c0_i32 = arith.constant 0 : i32
    %c0_i32_0 = arith.constant 0 : i32
    return %arg0, %c0_i32 : i32, i32
  }
}

</mosaic_0001>

<bundles_post_ra>
// kernel: tpu_custom_call.1
= control target key start
LH: loop header
LB: loop body
LE: loop exit
PB: predicated region body
PF: predicated region fallthrough
CT: control target
= control target key end

     0   :  { %s1150_s0 = inlined_call_operand.vmem [shape: f32[256,576], index: 0, kind: input, shape index: {}]   ;;  %s1151_s1 = inlined_call_operand.vmem [shape: f32[8,256], index: 1, kind: input, shape index: {}]   ;;  %s1152_s2 = inlined_call_operand.hbm [shape: f32[8,576], index: 2, kind: output, shape index: {}]  }
   0x1   :  { %v15_v0 = vld [vmem:[%s1150_s0 + $0x8] sm:$0xff]  ;;  %v20_v1 = vld [vmem:[%s1150_s0 + $0x30] sm:$0xff]  ;;  %v14_v2 = vld [vmem:[%s1150_s0] sm:$0xff] }
   0x2   :  { %v441_v3 = vpack.c.bf16 %v20_v1, %v15_v0  ;;  %v19_v4 = vld [vmem:[%s1150_s0 + $0x28] sm:$0xff]  ;;  %v25_v5 = vld [vmem:[%s1150_s0 + $0x58] sm:$0xff]  ;;  %v30_v6 = vld [vmem:[%s1150_s0 + $0x80] sm:$0xff] }
   0x3   :  { %v443_v7 = vpack.c.bf16 %v19_v4, %v14_v2  ;;  %v445_v8 = vpack.c.bf16 %v30_v6, %v25_v5  ;;  %v24_v9 = vld [vmem:[%s1150_s0 + $0x50] sm:$0xff]  ;;  %v29_v10 = vld [vmem:[%s1150_s0 + $0x78] sm:$0xff]  ;;  %v35_v11 = vld [vmem:[%s1150_s0 + $0xa8] sm:$0xff] }
   0x4   :  { %442 = vmatprep.subr.bf16.mxu0 %v441_v3  ;;  %v40_v12 = vld [vmem:[%s1150_s0 + $0xd0] sm:$0xff]  ;;  %v447_v13 = vpack.c.bf16 %v29_v10, %v24_v9  ;;  %v34_v15 = vld [vmem:[%s1150_s0 + $0xa0] sm:$0xff]  ;;  %v39_v16 = vld [vmem:[%s1150_s0 + $0xc8] sm:$0xff] }
   0x5   :  { %444 = vmatpush1.bf16.msra.mxu0 %v443_v7  ;;  %v449_v14 = vpack.c.bf16 %v40_v12, %v35_v11  ;;  %v45_v17 = vld [vmem:[%s1150_s0 + $0xf8] sm:$0xff]  ;;  %v50_v18 = vld [vmem:[%s1150_s0 + $0x120] sm:$0xff]  ;;  %v451_v19 = vpack.c.bf16 %v39_v16, %v34_v15  ;;  %v44_v21 = vld [vmem:[%s1150_s0 + $0xf0] sm:$0xff] }
   0x6   :  { %446 = vmatprep.subr.bf16.mxu0 %v445_v8  ;;  %v453_v20 = vpack.c.bf16 %v50_v18, %v45_v17  ;;  %v49_v22 = vld [vmem:[%s1150_s0 + $0x118] sm:$0xff]  ;;  %v55_v23 = vld [vmem:[%s1150_s0 + $0x148] sm:$0xff]  ;;  %v60_v24 = vld [vmem:[%s1150_s0 + $0x170] sm:$0xff] }
   0x7   :  { %v455_v25 = vpack.c.bf16 %v49_v22, %v44_v21  ;;  %v17_v26 = vld [vmem:[%s1150_s0 + $0x18] sm:$0xff]  ;;  %v22_v27 = vld [vmem:[%s1150_s0 + $0x40] sm:$0xff]  ;;  %v16_v28 = vld [vmem:[%s1150_s0 + $0x10] sm:$0xff]  ;;  %v457_v29 = vpack.c.bf16 %v60_v24, %v55_v23 }
   0x8   :  { %v54_v30 = vld [vmem:[%s1150_s0 + $0x140] sm:$0xff]  ;;  %v59_v31 = vld [vmem:[%s1150_s0 + $0x168] sm:$0xff]  ;;  %v505_v32 = vpack.c.bf16 %v22_v27, %v17_v26  ;;  %v21_v33 = vld [vmem:[%s1150_s0 + $0x38] sm:$0xff] }
   0x9   :  { %448 = vmatpush1.bf16.msra.mxu0 %v447_v13  ;;  %v65_v34 = vld [vmem:[%s1150_s0 + $0x198] sm:$0xff]  ;;  %v70_v35 = vld [vmem:[%s1150_s0 + $0x1c0] sm:$0xff]  ;;  %v507_v36 = vpack.c.bf16 %v21_v33, %v16_v28  ;;  %v27_v37 = vld [vmem:[%s1150_s0 + $0x68] sm:$0xff]  ;;  %v459_v41 = vpack.c.bf16 %v59_v31, %v54_v30 }
   0xa   :  { %450 = vmatprep.subr.bf16.mxu0 %v449_v14  ;;  %506 = vmatprep.subr.bf16.mxu1 %v505_v32  ;;  %v32_v38 = vld [vmem:[%s1150_s0 + $0x90] sm:$0xff]  ;;  %v26_v39 = vld [vmem:[%s1150_s0 + $0x60] sm:$0xff]  ;;  %v31_v40 = vld [vmem:[%s1150_s0 + $0x88] sm:$0xff]  ;;  %v461_v46 = vpack.c.bf16 %v70_v35, %v65_v34 }
   0xb   :  { %v64_v42 = vld [vmem:[%s1150_s0 + $0x190] sm:$0xff]  ;;  %v69_v43 = vld [vmem:[%s1150_s0 + $0x1b8] sm:$0xff]  ;;  %508 = vmatpush1.bf16.msra.mxu1 %v507_v36  ;;  %v509_v44 = vpack.c.bf16 %v32_v38, %v27_v37  ;;  %v511_v45 = vpack.c.bf16 %v31_v40, %v26_v39  ;;  %v75_v47 = vld [vmem:[%s1150_s0 + $0x1e8] sm:$0xff] }
   0xc   :  { %v37_v48 = vld [vmem:[%s1150_s0 + $0xb8] sm:$0xff]  ;;  %v42_v49 = vld [vmem:[%s1150_s0 + $0xe0] sm:$0xff]  ;;  %v80_v50 = vld [vmem:[%s1150_s0 + $0x210] sm:$0xff]  ;;  %v463_v54 = vpack.c.bf16 %v69_v43, %v64_v42 }
   0xd   :  { %452 = vmatpush1.bf16.msra.mxu0 %v451_v19  ;;  %510 = vmatprep.subr.bf16.mxu1 %v509_v44  ;;  %v513_v51 = vpack.c.bf16 %v42_v49, %v37_v48  ;;  %v36_v52 = vld [vmem:[%s1150_s0 + $0xb0] sm:$0xff]  ;;  %v41_v53 = vld [vmem:[%s1150_s0 + $0xd8] sm:$0xff]  ;;  %v74_v55 = vld [vmem:[%s1150_s0 + $0x1e0] sm:$0xff]  ;;  %v465_v59 = vpack.c.bf16 %v80_v50, %v75_v47 }
   0xe   :  { %454 = vmatprep.subr.bf16.mxu0 %v453_v20  ;;  %v515_v56 = vpack.c.bf16 %v41_v53, %v36_v52  ;;  %v47_v57 = vld [vmem:[%s1150_s0 + $0x108] sm:$0xff]  ;;  %v52_v58 = vld [vmem:[%s1150_s0 + $0x130] sm:$0xff]  ;;  %v46_v62 = vld [vmem:[%s1150_s0 + $0x100] sm:$0xff] }
   0xf   :  { %512 = vmatpush1.bf16.msra.mxu1 %v511_v45  ;;  %v79_v60 = vld [vmem:[%s1150_s0 + $0x208] sm:$0xff]  ;;  %v517_v61 = vpack.c.bf16 %v52_v58, %v47_v57  ;;  %v85_v0 = vld [vmem:[%s1150_s0 + $0x238] sm:$0xff]  ;;  %v90_v1 = vld [vmem:[%s1150_s0 + $0x260] sm:$0xff] }
  0x10   :  { %514 = vmatprep.subr.bf16.mxu1 %v513_v51  ;;  %v51_v63 = vld [vmem:[%s1150_s0 + $0x128] sm:$0xff]  ;;  %v57_v2 = vld [vmem:[%s1150_s0 + $0x158] sm:$0xff]  ;;  %v62_v3 = vld [vmem:[%s1150_s0 + $0x180] sm:$0xff]  ;;  %v467_v4 = vpack.c.bf16 %v79_v60, %v74_v55  ;;  %v469_v8 = vpack.c.bf16 %v90_v1, %v85_v0 }
  0x11   :  { %456 = vmatpush1.bf16.msra.mxu0 %v455_v25  ;;  %v84_v5 = vld [vmem:[%s1150_s0 + $0x230] sm:$0xff]  ;;  %v89_v6 = vld [vmem:[%s1150_s0 + $0x258] sm:$0xff]  ;;  %v519_v7 = vpack.c.bf16 %v51_v63, %v46_v62  ;;  %v95_v9 = vld [vmem:[%s1150_s0 + $0x288] sm:$0xff]  ;;  %v521_v10 = vpack.c.bf16 %v62_v3, %v57_v2 }
  0x12   :  { %458 = vmatprep.subr.bf16.mxu0 %v457_v29  ;;  %v56_v11 = vld [vmem:[%s1150_s0 + $0x150] sm:$0xff]  ;;  %v61_v12 = vld [vmem:[%s1150_s0 + $0x178] sm:$0xff]  ;;  %v67_v14 = vld [vmem:[%s1150_s0 + $0x1a8] sm:$0xff]  ;;  %v471_v16 = vpack.c.bf16 %v89_v6, %v84_v5 }
  0x13   :  { %516 = vmatpush1.bf16.msra.mxu1 %v515_v56  ;;  %v100_v13 = vld [vmem:[%s1150_s0 + $0x2b0] sm:$0xff]  ;;  %v94_v17 = vld [vmem:[%s1150_s0 + $0x280] sm:$0xff]  ;;  %v99_v18 = vld [vmem:[%s1150_s0 + $0x2a8] sm:$0xff]  ;;  %v523_v19 = vpack.c.bf16 %v61_v12, %v56_v11 }
  0x14   :  { %518 = vmatprep.subr.bf16.mxu1 %v517_v61  ;;  %v72_v15 = vld [vmem:[%s1150_s0 + $0x1d0] sm:$0xff]  ;;  %v473_v20 = vpack.c.bf16 %v100_v13, %v95_v9  ;;  %v105_v21 = vld [vmem:[%s1150_s0 + $0x2d8] sm:$0xff]  ;;  %v66_v23 = vld [vmem:[%s1150_s0 + $0x1a0] sm:$0xff]  ;;  %v475_v28 = vpack.c.bf16 %v99_v18, %v94_v17 }
  0x15   :  { %460 = vmatpush1.bf16.msra.mxu0 %v459_v41  ;;  %v525_v22 = vpack.c.bf16 %v72_v15, %v67_v14  ;;  %v71_v24 = vld [vmem:[%s1150_s0 + $0x1c8] sm:$0xff]  ;;  %v110_v25 = vld [vmem:[%s1150_s0 + $0x300] sm:$0xff]  ;;  %v77_v26 = vld [vmem:[%s1150_s0 + $0x1f8] sm:$0xff] }
  0x16   :  { %462 = vmatprep.subr.bf16.mxu0 %v461_v46  ;;  %v82_v27 = vld [vmem:[%s1150_s0 + $0x220] sm:$0xff]  ;;  %v104_v29 = vld [vmem:[%s1150_s0 + $0x2d0] sm:$0xff]  ;;  %v109_v30 = vld [vmem:[%s1150_s0 + $0x2f8] sm:$0xff]  ;;  %v527_v31 = vpack.c.bf16 %v71_v24, %v66_v23  ;;  %v477_v33 = vpack.c.bf16 %v110_v25, %v105_v21 }
  0x17   :  { %520 = vmatpush1.bf16.msra.mxu1 %v519_v7  ;;  %v843_v32 = vld [vmem:[%s1151_s1 + $0x8] sm:$0xff]  ;;  %v529_v35 = vpack.c.bf16 %v82_v27, %v77_v26  ;;  %v76_v36 = vld [vmem:[%s1150_s0 + $0x1f0] sm:$0xff]  ;;  %v81_v37 = vld [vmem:[%s1150_s0 + $0x218] sm:$0xff]  ;;  %v479_v41 = vpack.c.bf16 %v109_v30, %v104_v29 }
  0x18   :  { %522 = vmatprep.subr.bf16.mxu1 %v521_v10  ;;  %v115_v34 = vld [vmem:[%s1150_s0 + $0x328] sm:$0xff]  ;;  %v120_v38 = vld [vmem:[%s1150_s0 + $0x350] sm:$0xff]  ;;  %238 = vmatprep.mubr.f32.mxu0 %v843_v32  ;;  %v114_v42 = vld [vmem:[%s1150_s0 + $0x320] sm:$0xff]  ;;  %v531_v44 = vpack.c.bf16 %v81_v37, %v76_v36 }
  0x19   :  { %464 = vmatpush1.bf16.msra.mxu0 %v463_v54  ;;  %v87_v39 = vld [vmem:[%s1150_s0 + $0x248] sm:$0xff]  ;;  %v92_v40 = vld [vmem:[%s1150_s0 + $0x270] sm:$0xff]  ;;  %309 = vmatprep.mubr.f32.mxu1 %v843_v32  ;;  %v481_v45 = vpack.c.bf16 %v120_v38, %v115_v34  ;;  %v125_v46 = vld [vmem:[%s1150_s0 + $0x378] sm:$0xff] }
  0x1a   :  { %466 = vmatprep.subr.bf16.mxu0 %v465_v59  ;;  %v119_v43 = vld [vmem:[%s1150_s0 + $0x348] sm:$0xff]  ;;  %v533_v47 = vpack.c.bf16 %v92_v40, %v87_v39  ;;  %v86_v48 = vld [vmem:[%s1150_s0 + $0x240] sm:$0xff]  ;;  %v97_v51 = vld [vmem:[%s1150_s0 + $0x298] sm:$0xff] }
  0x1b   :  { %524 = vmatpush1.bf16.msra.mxu1 %v523_v19  ;;  %v91_v49 = vld [vmem:[%s1150_s0 + $0x268] sm:$0xff]  ;;  %v130_v50 = vld [vmem:[%s1150_s0 + $0x3a0] sm:$0xff]  ;;  %v483_v53 = vpack.c.bf16 %v119_v43, %v114_v42  ;;  %v124_v54 = vld [vmem:[%s1150_s0 + $0x370] sm:$0xff] }
  0x1c   :  { %526 = vmatprep.subr.bf16.mxu1 %v525_v22  ;;  %v102_v52 = vld [vmem:[%s1150_s0 + $0x2c0] sm:$0xff]  ;;  %v129_v55 = vld [vmem:[%s1150_s0 + $0x398] sm:$0xff]  ;;  %v535_v56 = vpack.c.bf16 %v91_v49, %v86_v48  ;;  %v485_v57 = vpack.c.bf16 %v130_v50, %v125_v46  ;;  %v135_v58 = vld [vmem:[%s1150_s0 + $0x3c8] sm:$0xff] }
  0x1d   :  { %468 = vmatpush1.bf16.msra.mxu0 %v467_v4  ;;  %v537_v59 = vpack.c.bf16 %v102_v52, %v97_v51  ;;  %v96_v60 = vld [vmem:[%s1150_s0 + $0x290] sm:$0xff]  ;;  %v101_v61 = vld [vmem:[%s1150_s0 + $0x2b8] sm:$0xff]  ;;  %v107_v63 = vld [vmem:[%s1150_s0 + $0x2e8] sm:$0xff]  ;;  %v487_v1 = vpack.c.bf16 %v129_v55, %v124_v54 }
  0x1e   :  { %470 = vmatprep.subr.bf16.mxu0 %v469_v8  ;;  %v140_v62 = vld [vmem:[%s1150_s0 + $0x3f0] sm:$0xff]  ;;  %v134_v2 = vld [vmem:[%s1150_s0 + $0x3c0] sm:$0xff]  ;;  %v139_v3 = vld [vmem:[%s1150_s0 + $0x3e8] sm:$0xff]  ;;  %v539_v4 = vpack.c.bf16 %v101_v61, %v96_v60 }
  0x1f   :  { %528 = vmatpush1.bf16.msra.mxu1 %v527_v31  ;;  %v112_v0 = vld [vmem:[%s1150_s0 + $0x310] sm:$0xff]  ;;  %v489_v5 = vpack.c.bf16 %v140_v62, %v135_v58  ;;  %v145_v6 = vld [vmem:[%s1150_s0 + $0x418] sm:$0xff]  ;;  %v106_v8 = vld [vmem:[%s1150_s0 + $0x2e0] sm:$0xff]  ;;  %v491_v13 = vpack.c.bf16 %v139_v3, %v134_v2 }
  0x20   :  { %530 = vmatprep.subr.bf16.mxu1 %v529_v35  ;;  %v541_v7 = vpack.c.bf16 %v112_v0, %v107_v63  ;;  %v111_v9 = vld [vmem:[%s1150_s0 + $0x308] sm:$0xff]  ;;  %v150_v10 = vld [vmem:[%s1150_s0 + $0x440] sm:$0xff]  ;;  %v117_v11 = vld [vmem:[%s1150_s0 + $0x338] sm:$0xff] }
  0x21   :  { %472 = vmatpush1.bf16.msra.mxu0 %v471_v16  ;;  %v122_v12 = vld [vmem:[%s1150_s0 + $0x360] sm:$0xff]  ;;  %v144_v14 = vld [vmem:[%s1150_s0 + $0x410] sm:$0xff]  ;;  %v149_v15 = vld [vmem:[%s1150_s0 + $0x438] sm:$0xff]  ;;  %v543_v16 = vpack.c.bf16 %v111_v9, %v106_v8  ;;  %v493_v17 = vpack.c.bf16 %v150_v10, %v145_v6 }
  0x22   :  { %474 = vmatprep.subr.bf16.mxu0 %v473_v20  ;;  %v155_v18 = vld [vmem:[%s1150_s0 + $0x468] sm:$0xff]  ;;  %v545_v19 = vpack.c.bf16 %v122_v12, %v117_v11  ;;  %v116_v20 = vld [vmem:[%s1150_s0 + $0x330] sm:$0xff]  ;;  %v121_v21 = vld [vmem:[%s1150_s0 + $0x358] sm:$0xff]  ;;  %v495_v25 = vpack.c.bf16 %v149_v15, %v144_v14 }
  0x23   :  { %532 = vmatpush1.bf16.msra.mxu1 %v531_v44  ;;  %v160_v22 = vld [vmem:[%s1150_s0 + $0x490] sm:$0xff]  ;;  %v127_v23 = vld [vmem:[%s1150_s0 + $0x388] sm:$0xff]  ;;  %v154_v26 = vld [vmem:[%s1150_s0 + $0x460] sm:$0xff]  ;;  %v547_v29 = vpack.c.bf16 %v121_v21, %v116_v20 }
  0x24   :  { %534 = vmatprep.subr.bf16.mxu1 %v533_v47  ;;  %v132_v24 = vld [vmem:[%s1150_s0 + $0x3b0] sm:$0xff]  ;;  %v159_v27 = vld [vmem:[%s1150_s0 + $0x488] sm:$0xff]  ;;  %v497_v30 = vpack.c.bf16 %v160_v22, %v155_v18  ;;  %v170_v31 = vld [vmem:[%s1150_s0 + $0x4e0] sm:$0xff] }
  0x25   :  { %476 = vmatpush1.bf16.msra.mxu0 %v475_v28  ;;  %v165_v28 = vld [vmem:[%s1150_s0 + $0x4b8] sm:$0xff]  ;;  %v126_v34 = vld [vmem:[%s1150_s0 + $0x380] sm:$0xff]  ;;  %v131_v35 = vld [vmem:[%s1150_s0 + $0x3a8] sm:$0xff] }
  0x26   :  { %478 = vmatprep.subr.bf16.mxu0 %v477_v33  ;;  %v549_v33 = vpack.c.bf16 %v132_v24, %v127_v23  ;;  %v137_v36 = vld [vmem:[%s1150_s0 + $0x3d8] sm:$0xff]  ;;  %v142_v37 = vld [vmem:[%s1150_s0 + $0x400] sm:$0xff] }
  0x27   :  { %536 = vmatpush1.bf16.msra.mxu1 %v535_v56 }
  0x28   :  { %538 = vmatprep.subr.bf16.mxu1 %v537_v59 }
  0x29   :  { %480 = vmatpush1.bf16.msra.mxu0 %v479_v41 }
  0x2a   :  { %482 = vmatprep.subr.bf16.mxu0 %v481_v45 }
  0x2b   :  { %540 = vmatpush1.bf16.msra.mxu1 %v539_v4 }
  0x2c   :  { %542 = vmatprep.subr.bf16.mxu1 %v541_v7 }
  0x2d   :  { %484 = vmatpush1.bf16.msra.mxu0 %v483_v53 }
  0x2e   :  { %486 = vmatprep.subr.bf16.mxu0 %v485_v57 }
  0x2f   :  { %544 = vmatpush1.bf16.msra.mxu1 %v543_v16 }
  0x30   :  { %546 = vmatprep.subr.bf16.mxu1 %v545_v19 }
  0x31   :  { %488 = vmatpush1.bf16.msra.mxu0 %v487_v1 }
  0x32   :  { %490 = vmatprep.subr.bf16.mxu0 %v489_v5 }
  0x35   :  { %492 = vmatpush1.bf16.msra.mxu0 %v491_v13 }
  0x36   :  { %494 = vmatprep.subr.bf16.mxu0 %v493_v17 }
  0x37   :  { %7 = vsyncpa [#allocation3], 0  ;;  %v499_v38 = vpack.c.bf16 %v159_v27, %v154_v26  ;;  %v164_v39 = vld [vmem:[%s1150_s0 + $0x4b0] sm:$0xff]  ;;  %v169_v40 = vld [vmem:[%s1150_s0 + $0x4d8] sm:$0xff]  ;;  %548 = vmatpush1.bf16.msra.mxu1 %v547_v29  ;;  %v551_v41 = vpack.c.bf16 %v131_v35, %v126_v34  ;;  %v501_v42 = vpack.c.bf16 %v170_v31, %v165_v28  ;;  %v553_v44 = vpack.c.bf16 %v142_v37, %v137_v36 }
  0x38   :  { %v98_v43 = vld [vmem:[%s1150_s0 + $0x2a0] sm:$0xff]  ;;  %550 = vmatprep.subr.bf16.mxu1 %v549_v33  ;;  %v136_v45 = vld [vmem:[%s1150_s0 + $0x3d0] sm:$0xff]  ;;  %v141_v46 = vld [vmem:[%s1150_s0 + $0x3f8] sm:$0xff]  ;;  %v503_v50 = vpack.c.bf16 %v169_v40, %v164_v39  ;;  %vm390_vm0 = vcmask 523264  }
  0x39   :  { %496 = vmatpush1.bf16.msra.mxu0 %v495_v25  ;;  %v103_v47 = vld [vmem:[%s1150_s0 + $0x2c8] sm:$0xff]  ;;  %v152_v49 = vld [vmem:[%s1150_s0 + $0x450] sm:$0xff]  ;;  %v18_v51 = vld [vmem:[%s1150_s0 + $0x20] sm:$0xff]  ;;  %v555_v53 = vpack.c.bf16 %v141_v46, %v136_v45 }
  0x3a   :  { %498 = vmatprep.subr.bf16.mxu0 %v497_v30  ;;  %v147_v48 = vld [vmem:[%s1150_s0 + $0x428] sm:$0xff]  ;;  %v569_v54 = vpack.c.bf16 %v103_v47, %v98_v43  ;;  %v108_v55 = vld [vmem:[%s1150_s0 + $0x2f0] sm:$0xff]  ;;  %v146_v57 = vld [vmem:[%s1150_s0 + $0x420] sm:$0xff] }
  0x3b   :  { %v23_v52 = vld [vmem:[%s1150_s0 + $0x48] sm:$0xff]  ;;  %552 = vmatpush1.bf16.msra.mxu1 %v551_v41  ;;  %v557_v56 = vpack.c.bf16 %v152_v49, %v147_v48  ;;  %v113_v59 = vld [vmem:[%s1150_s0 + $0x318] sm:$0xff]  ;;  %v162_v61 = vld [vmem:[%s1150_s0 + $0x4a0] sm:$0xff] }
  0x3c   :  { %554 = vmatprep.subr.bf16.mxu1 %v553_v44  ;;  %v151_v58 = vld [vmem:[%s1150_s0 + $0x448] sm:$0xff]  ;;  %v157_v60 = vld [vmem:[%s1150_s0 + $0x478] sm:$0xff]  ;;  %v1036_v62 = vld [vmem:[%s1151_s1] sm:$0xff]  ;;  %v571_v63 = vpack.c.bf16 %v23_v52, %v18_v51  ;;  %v573_v3 = vpack.c.bf16 %v113_v59, %v108_v55  ;;  %s626_s1 = smov [#allocation2]  }
  0x3d   :  { %500 = vmatpush1.bf16.msra.mxu0 %v499_v38  ;;  %v28_v0 = vld [vmem:[%s1150_s0 + $0x70] sm:$0xff]  ;;  %v33_v1 = vld [vmem:[%s1150_s0 + $0x98] sm:$0xff]  ;;  %v559_v2 = vpack.c.bf16 %v151_v58, %v146_v57  ;;  %v118_v4 = vld [vmem:[%s1150_s0 + $0x340] sm:$0xff]  ;;  %v561_v5 = vpack.c.bf16 %v162_v61, %v157_v60  ;;  %s398_s23 = sshll.u32 %s626_s1, 4  ;;  %s399_s23 = int_to_ptr.vmem [resolvable:$true] %s398_s23 }
  0x3e   :  { %502 = vmatprep.subr.bf16.mxu0 %v501_v42  ;;  %v156_v6 = vld [vmem:[%s1150_s0 + $0x470] sm:$0xff]  ;;  %v161_v7 = vld [vmem:[%s1150_s0 + $0x498] sm:$0xff]  ;;  %v123_v8 = vld [vmem:[%s1150_s0 + $0x368] sm:$0xff]  ;;  %v575_v11 = vpack.c.bf16 %v33_v1, %v28_v0  ;;  %p607_p1 = scmp.lt.s32.totalorder %s399_s23, %s399_s23 }
  0x3f   :  { %556 = vmatpush1.bf16.msra.mxu1 %v555_v53  ;;  %v167_v9 = vld [vmem:[%s1150_s0 + $0x4c8] sm:$0xff]  ;;  %v172_v10 = vld [vmem:[%s1150_s0 + $0x4f0] sm:$0xff]  ;;  %v38_v12 = vld [vmem:[%s1150_s0 + $0xc0] sm:$0xff]  ;;  %v563_v13 = vpack.c.bf16 %v161_v7, %v156_v6  ;;  %v577_v14 = vpack.c.bf16 %v123_v8, %v118_v4 }
  0x40   :  { %558 = vmatprep.subr.bf16.mxu1 %v557_v56  ;;  %v43_v15 = vld [vmem:[%s1150_s0 + $0xe8] sm:$0xff]  ;;  %v565_v16 = vpack.c.bf16 %v172_v10, %v167_v9  ;;  %v166_v17 = vld [vmem:[%s1150_s0 + $0x4c0] sm:$0xff]  ;;  %v128_v19 = vld [vmem:[%s1150_s0 + $0x390] sm:$0xff] }
  0x41   :  { %504 = vmatpush1.bf16.msra.mxu0 %v503_v50  ;;  %v171_v18 = vld [vmem:[%s1150_s0 + $0x4e8] sm:$0xff]  ;;  %v133_v20 = vld [vmem:[%s1150_s0 + $0x3b8] sm:$0xff]  ;;  %v579_v21 = vpack.c.bf16 %v43_v15, %v38_v12  ;;  %v48_v24 = vld [vmem:[%s1150_s0 + $0x110] sm:$0xff] }
  0x42   :  { %570 = vmatprep.subr.bf16.mxu0 %v569_v54  ;;  %v567_v22 = vpack.c.bf16 %v171_v18, %v166_v17  ;;  %v581_v23 = vpack.c.bf16 %v133_v20, %v128_v19  ;;  %v53_v25 = vld [vmem:[%s1150_s0 + $0x138] sm:$0xff]  ;;  %v138_v26 = vld [vmem:[%s1150_s0 + $0x3e0] sm:$0xff]  ;;  %v63_v30 = vld [vmem:[%s1150_s0 + $0x188] sm:$0xff] }
  0x43   :  { %560 = vmatpush1.bf16.msra.mxu1 %v559_v2  ;;  %v583_v27 = vpack.c.bf16 %v53_v25, %v48_v24  ;;  %v58_v29 = vld [vmem:[%s1150_s0 + $0x160] sm:$0xff]  ;;  %v148_v31 = vld [vmem:[%s1150_s0 + $0x430] sm:$0xff]  ;;  %v153_v33 = vld [vmem:[%s1150_s0 + $0x458] sm:$0xff] }
  0x44   :  { %239 = vmatmul.mubr.f32.vlgmr.msra.gmra.mrb[0].mxu0 %v1036_v62  ;;  %562 = vmatprep.subr.bf16.mxu1 %v561_v5  ;;  %v587_v34 = vpack.c.bf16 %v63_v30, %v58_v29  ;;  %v589_v35 = vpack.c.bf16 %v153_v33, %v148_v31  ;;  %v68_v36 = vld [vmem:[%s1150_s0 + $0x1b0] sm:$0xff]  ;;  %v73_v37 = vld [vmem:[%s1150_s0 + $0x1d8] sm:$0xff]  ;;  %v158_v38 = vld [vmem:[%s1150_s0 + $0x480] sm:$0xff] }
  0x45   :  { %572 = vmatpush3.bf16.msra.mxu0 %v571_v63  ;;  %380 = vmatprep.mubr.f32.mxu0 %v843_v32  ;;  %v143_v32 = vld [vmem:[%s1150_s0 + $0x408] sm:$0xff]  ;;  %v591_v40 = vpack.c.bf16 %v73_v37, %v68_v36  ;;  %v78_v42 = vld [vmem:[%s1150_s0 + $0x200] sm:$0xff]  ;;  %v168_v44 = vld [vmem:[%s1150_s0 + $0x4d0] sm:$0xff] }
  0x46   :  { %574 = vmatprep.subr.bf16.mxu0 %v573_v3  ;;  %v585_v28 = vpack.c.bf16 %v143_v32, %v138_v26  ;;  %v163_v39 = vld [vmem:[%s1150_s0 + $0x4a8] sm:$0xff]  ;;  %v173_v45 = vld [vmem:[%s1150_s0 + $0x4f8] sm:$0xff]  ;;  %v88_v48 = vld [vmem:[%s1150_s0 + $0x250] sm:$0xff] }
  0x47   :  { %564 = vmatpush1.bf16.msra.mxu1 %v563_v13  ;;  %v593_v41 = vpack.c.bf16 %v163_v39, %v158_v38  ;;  %v83_v43 = vld [vmem:[%s1150_s0 + $0x228] sm:$0xff]  ;;  %v597_v47 = vpack.c.bf16 %v173_v45, %v168_v44  ;;  %v93_v49 = vld [vmem:[%s1150_s0 + $0x278] sm:$0xff]  ;;  %s602_s0 = scalar_lea.vmem %s399_s23, 640 }
  0x48   :  { %566 = vmatprep.subr.bf16.mxu1 %v565_v16  ;;  %v595_v46 = vpack.c.bf16 %v83_v43, %v78_v42  ;;  %v599_v50 = vpack.c.bf16 %v93_v49, %v88_v48  ;;  %p603_p0 = scmp.ne.s32.totalorder %s399_s23, %s602_s0  ;;  %p608_p2 = scmp.lt.s32.totalorder %s602_s0, %s602_s0 }
  0x49   :  { %576 = vmatpush3.bf16.msra.mxu0 %v575_v11 }
  0x4a   :  { %578 = vmatprep.subr.bf16.mxu0 %v577_v14  ;;  %p609_p3 = por %p608_p2, %p607_p1 }
  0x4b   :  { %568 = vmatpush1.bf16.msra.mxu1 %v567_v22 }
  0x4c   :  { %p610_p4 = pnand %p609_p3, %p603_p0 }
  0x4d   :  { %580 = vmatpush3.bf16.msra.mxu0 %v579_v21 }
  0x4e   :  { %582 = vmatprep.subr.bf16.mxu0 %v581_v23  ;;  %310 = vmatmul.mubr.f32.vlgmr.msra.gmra.mrb[0].mxu1 %v1036_v62 }
  0x51   :  { %584 = vmatpush3.bf16.msra.mxu0 %v583_v27 }
  0x52   :  { %586 = vmatprep.subr.bf16.mxu0 %v585_v28 }
  0x55   :  { %588 = vmatpush3.bf16.msra.mxu0 %v587_v34 }
  0x56   :  { %590 = vmatprep.subr.bf16.mxu0 %v589_v35 }
  0x59   :  { %592 = vmatpush3.bf16.msra.mxu0 %v591_v40 }
  0x5a   :  { %594 = vmatprep.subr.bf16.mxu0 %v593_v41 }
  0x5d   :  { %596 = vmatpush3.bf16.msra.mxu0 %v595_v46 }
  0x5e   :  { %598 = vmatprep.subr.bf16.mxu0 %v597_v47 }
  0x61   :  { %600 = vmatpush3.bf16.msra.mxu0 %v599_v50 }
  0x64   :  { %381 = vmatmul.mubr.f32.vlgmr.msra.gmra.mrb[2].mxu0 %v1036_v62 }
 0x117   :  { %v240_v51 = vpop.f32.mrb[0].mxu0 }
 0x118   :  { %386 = vst [vmem:[#allocation2] sm:$0xff] %v240_v51  ;;  %v242_v52 = vpop.f32.mrb[1].mxu0 }
 0x119   :  { %387 = vst [vmem:[#allocation2 + $0x8] sm:$0xff] %v242_v52 }
 0x121   :  { %v311_v53 = vpop.f32.mrb[0].mxu1 }
 0x122   :  { %388 = vst [vmem:[#allocation2 + $0x10] sm:$0xff] %v311_v53  ;;  %v313_v54 = vpop.f32.mrb[1].mxu1 }
 0x123   :  { %389 = vst [vmem:[#allocation2 + $0x18] sm:$0xff] %v313_v54 }
 0x137   :  { %v438_v55 = vpop.f32.mrb[2].mxu0 }
 0x138   :  { %v439_v56 = vpop.f32.mrb[3].mxu0 }
 0x139   :  { %v440_v57 = vadd.f32 %v439_v56, %v438_v55 }
 0x13b   :  { %391 = vst.msk [vmem:[#allocation2 + $0x20] sm:$0xff] %vm390_vm0, %v440_v57 }
 0x13c   :  { %613 = shalt.err (!%p610_p4)
}
 0x13d   :  { %s614_s26 = scalar_lea.hbm %s1152_s2, 640 }
 0x13e   :  { %p615_p5 = scmp.ne.s32.totalorder %s1152_s2, %s614_s26  ;;  %p618_p6 = scmp.lt.u32.totalorder %s614_s26, %s1152_s2 }
 0x140   :  { %p620_p7 = pnand %p618_p6, %p615_p5 }
 0x142   :  { %623 = shalt.err (!%p620_p7)
}
 0x143   :  { %401 = dma.vmem_to_hbm [thread:$0]  %s399_s23, 640, %s1152_s2, [#allocation3]  }
 0x144   :  { %624 = dma.done.wait [#allocation3], 640  }
 0x145   :  { %625 = vsyncadd [#allocation3], 4294966656 }
 0x146   :  { %405 = vsyncpa [#allocation3], 1 }

</bundles_post_ra>
